<compile_context>
chip_gen: v5e
topology: v5e:2x2
jax: 0.10.0
libtpu: 0.0.40
codegen_flags: <defaults>
</compile_context>

<pallas_src>
import functools

import jax
import jax.numpy as jnp
from jax import lax
from jax.experimental import pallas as pl
from jax.experimental.pallas import tpu as pltpu


def _round_up(x: int, m: int) -> int:
    return ((x + m - 1) // m) * m


# -----------------------------------------------------------------------------
# Transposed path (C < 128):  out^T[C, B] = W[C, D] . x[B, D]^T
# -----------------------------------------------------------------------------
def _linear_t_kernel(w_ref, x_ref, o_ref, *, k_tiled, tk):
    """w_ref: (c_pad, d_pad) full weight, VMEM-resident (fetched once).
       x_ref: (tm, tk)       B-tile of x (tk == d_pad when K is collapsed).
       o_ref: (c_pad, tm)    transposed output tile (lanes = B)."""
    if not k_tiled:
        o_ref[...] = lax.dot_general(
            w_ref[...], x_ref[...],
            dimension_numbers=(((1,), (1,)), ((), ())),
            preferred_element_type=jnp.float32,
        ).astype(o_ref.dtype)
    else:
        k = pl.program_id(1)

        @pl.when(k == 0)
        def _():
            o_ref[...] = jnp.zeros_like(o_ref)

        start = pl.multiple_of(k * tk, 128)
        w_blk = w_ref[:, pl.ds(start, tk)]
        o_ref[...] += lax.dot_general(
            w_blk, x_ref[...],
            dimension_numbers=(((1,), (1,)), ((), ())),
            preferred_element_type=jnp.float32,
        )


def _forward_transposed(x_c, w_c, B, C, D, isize):
    """Returns [B, C] float32, or None if the weight cannot be pinned in VMEM."""
    X_BUDGET = 12 << 20     # double-buffered x block budget
    W_BUDGET = 8 << 20      # resident weight budget (counted x2, conservative)

    c_pad = _round_up(C, 8)      # sublanes only — no 128x amplification of W/out
    b_pad = _round_up(B, 128)    # B is the lane axis of the output
    d_pad = _round_up(D, 128)

    if 2 * 128 * d_pad * isize <= X_BUDGET:
        tk, k_tiled = d_pad, False          # collapse the reduction
    else:
        tk, k_tiled = 2048, True
        d_pad = _round_up(d_pad, tk)

    if 2 * c_pad * d_pad * isize > W_BUDGET:
        return None                         # fall back to the standard path

    tm = 128
    for cand in (1024, 512, 256, 128):
        if b_pad % cand == 0 and 2 * cand * tk * isize <= X_BUDGET:
            tm = cand
            break

    n_b = b_pad // tm
    n_k = d_pad // tk

    # Pad only when needed (zeros do not change the contraction).
    x_p = x_c if (b_pad, d_pad) == (B, D) else jnp.pad(
        x_c, ((0, b_pad - B), (0, d_pad - D)))
    w_p = w_c if (c_pad, d_pad) == (C, D) else jnp.pad(
        w_c, ((0, c_pad - C), (0, d_pad - D)))

    if k_tiled:
        grid = (n_b, n_k)
        w_spec = pl.BlockSpec((c_pad, d_pad), lambda i, k: (0, 0))   # resident
        x_spec = pl.BlockSpec((tm, tk), lambda i, k: (i, k))
        o_spec = pl.BlockSpec((c_pad, tm), lambda i, k: (0, i))
        semantics = ("parallel", "arbitrary")
    else:
        grid = (n_b,)
        w_spec = pl.BlockSpec((c_pad, d_pad), lambda i: (0, 0))      # resident
        x_spec = pl.BlockSpec((tm, tk), lambda i: (i, 0))
        o_spec = pl.BlockSpec((c_pad, tm), lambda i: (0, i))
        semantics = ("parallel",)

    need = 2 * c_pad * d_pad * isize + 2 * tm * tk * isize + 2 * c_pad * tm * 4
    vmem_limit = int(min(max(need * 3 // 2, 16 << 20), 32 << 20))

    cost = pl.CostEstimate(
        flops=2 * b_pad * c_pad * d_pad,
        transcendentals=0,
        bytes_accessed=(b_pad * d_pad + c_pad * d_pad) * isize + c_pad * b_pad * 4,
    )

    kernel = functools.partial(_linear_t_kernel, k_tiled=k_tiled, tk=tk)

    out_t = pl.pallas_call(
        kernel,
        out_shape=jax.ShapeDtypeStruct((c_pad, b_pad), jnp.float32),
        grid_spec=pltpu.PrefetchScalarGridSpec(
            num_scalar_prefetch=0,
            grid=grid,
            in_specs=[w_spec, x_spec],
            out_specs=o_spec,
        ),
        compiler_params=pltpu.CompilerParams(
            dimension_semantics=semantics,
            vmem_limit_bytes=vmem_limit,
        ),
        cost_estimate=cost,
    )(w_p, x_p)

    # [C, B] -> [B, C]; for C == 1 this is effectively a reshape.
    return out_t[:C, :B].T


# -----------------------------------------------------------------------------
# Standard path (C >= 128, or W too large to pin):  out[B, C] = x . W^T
# -----------------------------------------------------------------------------
def _linear_std_kernel(x_ref, w_ref, o_ref, *, k_tiled):
    """x_ref: (tm, tk), w_ref: (tn, tk) native [C, D] layout, o_ref: (tm, tn)."""
    partial = lax.dot_general(
        x_ref[...], w_ref[...],
        dimension_numbers=(((1,), (1,)), ((), ())),
        preferred_element_type=jnp.float32,
    )
    if not k_tiled:
        o_ref[...] = partial.astype(o_ref.dtype)
    else:
        k = pl.program_id(2)

        @pl.when(k == 0)
        def _():
            o_ref[...] = jnp.zeros_like(o_ref)

        o_ref[...] += partial


def _forward_standard(x_c, w_c, B, C, D, isize):
    b_pad = _round_up(B, 8)
    c_pad = _round_up(C, 128)
    d_pad = _round_up(D, 128)

    if d_pad <= 1024:
        tk = d_pad                                   # collapse the reduction
    else:
        tk = 512 if d_pad % 512 == 0 else (256 if d_pad % 256 == 0 else 128)
    tn = 256 if c_pad % 256 == 0 else 128
    if b_pad <= 512:
        tm = b_pad
    else:
        b_pad = _round_up(b_pad, 256)
        tm = 256

    n_b, n_c, n_k = b_pad // tm, c_pad // tn, d_pad // tk
    k_tiled = n_k > 1

    x_p = x_c if (b_pad, d_pad) == (B, D) else jnp.pad(
        x_c, ((0, b_pad - B), (0, d_pad - D)))
    w_p = w_c if (c_pad, d_pad) == (C, D) else jnp.pad(
        w_c, ((0, c_pad - C), (0, d_pad - D)))

    if k_tiled:
        grid = (n_b, n_c, n_k)
        x_spec = pl.BlockSpec((tm, tk), lambda i, j, k: (i, k))
        w_spec = pl.BlockSpec((tn, tk), lambda i, j, k: (j, k))
        o_spec = pl.BlockSpec((tm, tn), lambda i, j, k: (i, j))
        semantics = ("parallel", "parallel", "arbitrary")
    else:
        grid = (n_b, n_c)
        x_spec = pl.BlockSpec((tm, tk), lambda i, j: (i, 0))
        w_spec = pl.BlockSpec((tn, tk), lambda i, j: (j, 0))
        o_spec = pl.BlockSpec((tm, tn), lambda i, j: (i, j))
        semantics = ("parallel", "parallel")

    need = 2 * (tm * tk + tn * tk) * isize + 2 * tm * tn * 4
    vmem_limit = int(min(max(need * 3 // 2, 16 << 20), 32 << 20))

    cost = pl.CostEstimate(
        flops=2 * b_pad * c_pad * d_pad,
        transcendentals=0,
        bytes_accessed=(n_c * b_pad * d_pad + n_b * c_pad * d_pad) * isize
        + b_pad * c_pad * 4,
    )

    kernel = functools.partial(_linear_std_kernel, k_tiled=k_tiled)

    out = pl.pallas_call(
        kernel,
        out_shape=jax.ShapeDtypeStruct((b_pad, c_pad), jnp.float32),
        grid_spec=pltpu.PrefetchScalarGridSpec(
            num_scalar_prefetch=0,
            grid=grid,
            in_specs=[x_spec, w_spec],
            out_specs=o_spec,
        ),
        compiler_params=pltpu.CompilerParams(
            dimension_semantics=semantics,
            vmem_limit_bytes=vmem_limit,
        ),
        cost_estimate=cost,
    )(x_p, w_p)

    return out[:B, :C]


# -----------------------------------------------------------------------------
# Public wrapper
# -----------------------------------------------------------------------------
def logistic_regression_forward(x, weight, *, compute_dtype=jnp.float32,
                                use_fallback=True):
    """x: [B, D], weight: [C, D] (nn.Linear layout). Returns [B, C] float32."""
    B, D = x.shape
    C, D2 = weight.shape
    assert D == D2, f"input_dim mismatch: {D} vs {D2}"

    # Tiny problems: a single fused XLA dot beats any pallas_call overhead.
    if use_fallback and B * D * max(C, 1) <= (1 << 20):
        return (x @ weight.T).astype(jnp.float32)

    # Optional bf16 MXU path: cast HBM-side (halves DMA bytes); accumulation
    # stays f32 via preferred_element_type.  Default f32 matches PyTorch.
    if jnp.dtype(compute_dtype) != x.dtype:
        x_c = x.astype(compute_dtype)
        w_c = weight.astype(compute_dtype)
    else:
        x_c, w_c = x, weight
    isize = jnp.dtype(compute_dtype).itemsize

    if C < 128:
        out = _forward_transposed(x_c, w_c, B, C, D, isize)
        if out is not None:
            return out
    return _forward_standard(x_c, w_c, B, C, D, isize)


if __name__ == "__main__":
    # Shapes consistent with the module: batch=8, input_dim=128, num_classes=1.
    batch, input_dim, num_classes = 8, 128, 1

    key = jax.random.PRNGKey(0)
    kx, kw = jax.random.split(key)
    x = jax.random.normal(kx, (batch, input_dim), dtype=jnp.float32)
    # Deterministic init mimicking nn.Linear's uniform(-1/sqrt(D), 1/sqrt(D)).
    bound = 1.0 / (input_dim ** 0.5)
    weight = jax.random.uniform(
        kw, (num_classes, input_dim), dtype=jnp.float32, minval=-bound, maxval=bound
    )

    # Force the Pallas path (the default wrapper would route this tiny shape
    # to the jnp.dot fallback).
    out = logistic_regression_forward(x, weight, use_fallback=False)
    out = jax.block_until_ready(out)
    ref = x @ weight.T
    assert out.shape == (batch, num_classes)
    assert jnp.allclose(out, ref, atol=1e-4, rtol=1e-4)

    # Second small check: exercises multi-B-tile grid, padding and slicing.
    x2 = jax.random.normal(kx, (300, 200), dtype=jnp.float32)
    w2 = jax.random.normal(kw, (3, 200), dtype=jnp.float32) * 0.05
    out2 = logistic_regression_forward(x2, w2, use_fallback=False)
    out2 = jax.block_until_ready(out2)
    assert out2.shape == (300, 3)
    assert jnp.allclose(out2, x2 @ w2.T, atol=1e-4, rtol=1e-4)

    print("KERNEL_OK")
</pallas_src>

<mosaic_0001>
module attributes {stable_mosaic.version = 11 : i64} {
  func.func @_linear_t_kernel(%arg0: i32, %arg1: memref<8x128xf32, #tpu.memory_space<vmem>>, %arg2: memref<128x128xf32, #tpu.memory_space<vmem>>, %arg3: memref<8x128xf32, #tpu.memory_space<vmem>>) attributes {dimension_semantics = [#tpu.dimension_semantics<parallel>], iteration_bounds = array<i64: 1>, scalar_prefetch = 0 : i64, scratch_operands = 0 : i64, tpu.core_type = #tpu.core_type<tc>, window_params = [{pipeline_mode = #tpu.pipeline_mode<synchronous>, transform_indices = @transform_0, window_bounds = array<i64: 8, 128>}, {transform_indices = @transform_1, window_bounds = array<i64: 128, 128>}, {transform_indices = @transform_2, window_bounds = array<i64: 8, 128>}]} {
    %c0 = arith.constant 0 : index
    %c0_0 = arith.constant 0 : index
    %0 = vector.load %arg1[%c0, %c0_0] : memref<8x128xf32, #tpu.memory_space<vmem>>, vector<8x128xf32>
    %c0_1 = arith.constant 0 : index
    %c0_2 = arith.constant 0 : index
    %1 = vector.load %arg2[%c0_1, %c0_2] : memref<128x128xf32, #tpu.memory_space<vmem>>, vector<128x128xf32>
    %cst = arith.constant dense<0.000000e+00> : vector<8x128xf32>
    %2 = tpu.matmul %0, %1, %cst {dimension_numbers = #tpu.dot_dimension_numbers<[1], [1], [0], [0], [0, 0, 1, 0], [], []>} : vector<8x128xf32>, vector<128x128xf32>, vector<8x128xf32> -> vector<8x128xf32>
    %c0_3 = arith.constant 0 : index
    %c0_4 = arith.constant 0 : index
    %3 = vector.load %arg3[%c0_3, %c0_4] : memref<8x128xf32, #tpu.memory_space<vmem>>, vector<8x128xf32>
    tpu.vector_store %arg3[%c0_3, %c0_4], %2 {strides = array<i32>} : memref<8x128xf32, #tpu.memory_space<vmem>>, vector<8x128xf32>,
    return
  }
  func.func @transform_0(%arg0: i32) -> (i32, i32) {
    %c0_i32 = arith.constant 0 : i32
    %c0_i32_0 = arith.constant 0 : i32
    %c0_i32_1 = arith.constant 0 : i32
    return %c0_i32, %c0_i32_0 : i32, i32
  }
  func.func @transform_1(%arg0: i32) -> (i32, i32) {
    %c0_i32 = arith.constant 0 : i32
    %c0_i32_0 = arith.constant 0 : i32
    return %arg0, %c0_i32 : i32, i32
  }
  func.func @transform_2(%arg0: i32) -> (i32, i32) {
    %c0_i32 = arith.constant 0 : i32
    %c0_i32_0 = arith.constant 0 : i32
    return %c0_i32, %arg0 : i32, i32
  }
}

</mosaic_0001>

<bundles_post_ra>
// kernel: tpu_custom_call.1
= control target key start
LH: loop header
LB: loop body
LE: loop exit
PB: predicated region body
PF: predicated region fallthrough
CT: control target
= control target key end

     0   :  { %7 = vsyncpa [#allocation3], 0  ;;  %s210_s0 = inlined_call_operand.hbm [shape: f32[8,128], index: 0, kind: input, shape index: {}]   ;;  %s211_s1 = inlined_call_operand.hbm [shape: f32[128,128], index: 1, kind: input, shape index: {}]   ;;  %s212_s2 = inlined_call_operand.hbm [shape: f32[8,128], index: 2, kind: output, shape index: {}]  }
   0x1   :  { %8 = vsyncpa [#allocation6], 0 }
   0x2   :  { %9 = vsyncpa [#allocation4], 0  ;;  %s15_s11 = sshll.u32 %s210_s0, 4  ;;  %s181_s12 = smov [#allocation2]   ;;  %s16_s11 = int_to_ptr.hbm [resolvable:$true] %s15_s11 }
   0x3   :  { %s17_s13 = sshll.u32 %s181_s12, 4  ;;  %s25_s16 = sshll.u32 %s211_s1, 4  ;;  %s18_s13 = int_to_ptr.vmem [resolvable:$true] %s17_s13  ;;  %s26_s16 = int_to_ptr.hbm [resolvable:$true] %s25_s16 }
   0x4   :  { %20 = dma.hbm_to_vmem [thread:$0]  %s16_s11, 128, %s18_s13, [#allocation3]  }
   0x5   :  { %s182_s17 = smov [#allocation5]   ;;  %s183_s19 = smov 128  }
   0x6   :  { %s27_s18 = sshll.u32 %s182_s17, 4  ;;  %s184_s20 = smov 8   ;;  %s28_s18 = int_to_ptr.vmem [resolvable:$true] %s27_s18 }
   0x7   :  { %33 = dma.hbm_to_vmem [thread:$0]  %s26_s16, 2048, %s28_s18, [#allocation6], %s183_s19, %s183_s19, %s184_s20  }
   0x8   :  { %175 = dma.done.wait [#allocation3], 128  }
   0x9   :  { %176 = vsyncadd [#allocation3], 4294967168 }
   0xa   :  { %177 = dma.done.wait [#allocation6], 2048  }
   0xb   :  { %178 = vsyncadd [#allocation6], 4294965248  ;;  %v58_v0 = vld [vmem:[#allocation5 + $0x78] sm:$0xff]  ;;  %v57_v1 = vld [vmem:[#allocation5 + $0x70] sm:$0xff]  ;;  %s185_s0 = smov [#allocation7]   ;;  %s87_s23 = sshll.u32 %s212_s2, 4  ;;  %s88_s23 = int_to_ptr.hbm [resolvable:$true] %s87_s23 }
   0xc   :  { %59 = vmatpush.xpose.msra.mxu0 %v58_v0  ;;  %v56_v2 = vld [vmem:[#allocation5 + $0x68] sm:$0xff]  ;;  %v55_v3 = vld [vmem:[#allocation5 + $0x60] sm:$0xff]  ;;  %v54_v4 = vld [vmem:[#allocation5 + $0x58] sm:$0xff]  ;;  %s85_s1 = sshll.u32 %s185_s0, 4  ;;  %s86_s1 = int_to_ptr.vmem [resolvable:$true] %s85_s1 }
   0xd   :  { %v53_v5 = vld [vmem:[#allocation5 + $0x50] sm:$0xff]  ;;  %v52_v6 = vld [vmem:[#allocation5 + $0x48] sm:$0xff]  ;;  %v51_v7 = vld [vmem:[#allocation5 + $0x40] sm:$0xff] }
   0xe   :  { %v50_v8 = vld [vmem:[#allocation5 + $0x38] sm:$0xff]  ;;  %v49_v9 = vld [vmem:[#allocation5 + $0x30] sm:$0xff]  ;;  %v48_v10 = vld [vmem:[#allocation5 + $0x28] sm:$0xff] }
   0xf   :  { %v47_v11 = vld [vmem:[#allocation5 + $0x20] sm:$0xff]  ;;  %v46_v12 = vld [vmem:[#allocation5 + $0x18] sm:$0xff]  ;;  %v45_v13 = vld [vmem:[#allocation5 + $0x10] sm:$0xff] }
  0x10   :  { %60 = vmatpush.xpose.msra.mxu0 %v57_v1  ;;  %v44_v14 = vld [vmem:[#allocation5 + $0x8] sm:$0xff]  ;;  %v43_v15 = vld [vmem:[#allocation5] sm:$0xff]  ;;  %v42_v16 = vld [vmem:[#allocation2] sm:$0xff] }
  0x14   :  { %61 = vmatpush.xpose.msra.mxu0 %v56_v2 }
  0x18   :  { %62 = vmatpush.xpose.msra.mxu0 %v55_v3 }
  0x1c   :  { %63 = vmatpush.xpose.msra.mxu0 %v54_v4 }
  0x20   :  { %64 = vmatpush.xpose.msra.mxu0 %v53_v5 }
  0x24   :  { %65 = vmatpush.xpose.msra.mxu0 %v52_v6 }
  0x28   :  { %66 = vmatpush.xpose.msra.mxu0 %v51_v7 }
  0x2c   :  { %67 = vmatpush.xpose.msra.mxu0 %v50_v8 }
  0x30   :  { %68 = vmatpush.xpose.msra.mxu0 %v49_v9 }
  0x34   :  { %69 = vmatpush.xpose.msra.mxu0 %v48_v10 }
  0x38   :  { %70 = vmatpush.xpose.msra.mxu0 %v47_v11 }
  0x3c   :  { %71 = vmatpush.xpose.msra.mxu0 %v46_v12 }
  0x40   :  { %72 = vmatpush.xpose.msra.mxu0 %v45_v13 }
  0x44   :  { %73 = vmatpush.xpose.msra.mxu0 %v44_v14 }
  0x48   :  { %74 = vmatpush.xpose.msra.mxu0 %v43_v15 }
  0x4b   :  { %75 = vmatmul.f32.vlgmr.msra.gmra.mxu0 %v42_v16 }
  0xc8   :  { %v76_v17 = vpop.f32.mrf.mxu0 }
  0xc9   :  { %79 = vst [vmem:[#allocation7] sm:$0xff] %v76_v17 }
  0xca   :  { %90 = dma.vmem_to_hbm [thread:$0]  %s86_s1, 128, %s88_s23, [#allocation4]  }
  0xcb   :  { %179 = dma.done.wait [#allocation4], 128  }
  0xcc   :  { %180 = vsyncadd [#allocation4], 4294967168 }
  0xcd   :  { %95 = vsyncpa [#allocation3], 1 }
  0xce   :  { %96 = vsyncpa [#allocation6], 1 }
  0xcf   :  { %97 = vsyncpa [#allocation4], 1 }

</bundles_post_ra>
